<compile_context>
chip_gen: v7x
topology: tpu7x:2x2x1
jax: 0.10.0
libtpu: 0.0.40
codegen_flags: <defaults>
</compile_context>

<pallas_src>
import jax
import jax.numpy as jnp
from jax.experimental import pallas as pl
from jax.experimental.pallas import tpu as pltpu


_LANE = 128
_MAX_LANE = 4096                        # cap for the lane-dense last dim
_VMEM_BUDGET_BYTES = 24 * 1024 * 1024   # total for the 4 pipelined buffers (~6 MiB each)
_VMEM_LIMIT_BYTES = 48 * 1024 * 1024    # scoped ceiling: safe on v5e/v6e/v7x
_MIN_GRID_STEPS = 8                     # keep >=8 steps on big inputs (v7x 2-TC sharding)


def _relu_kernel(x_ref, o_ref):
    # Elementwise ReLU on the current VMEM tile (VPU max with zero).
    o_ref[...] = jnp.maximum(x_ref[...], 0)


def _round_up(x: int, m: int) -> int:
    return ((x + m - 1) // m) * m


def _sublane_multiple(dtype) -> int:
    # Native sublane packing: 8 rows for 32-bit, 16 for bf16/f16, 32 for int8/fp8.
    itemsize = jnp.dtype(dtype).itemsize
    return max(8, 32 // itemsize)


def _pick_lane(total: int):
    """Largest multiple-of-128 divisor of `total` (capped at _MAX_LANE).

    Returns (lane, needs_pad).  Only when `total` is not a multiple of 128 do
    we fall back to lane=128 with (<=127 elements of) padding.
    """
    if total % _LANE != 0:
        return _LANE, True
    units = total // _LANE
    for d in range(min(_MAX_LANE // _LANE, units), 0, -1):
        if units % d == 0:
            return _LANE * d, False
    return _LANE, False  # unreachable (d=1 always divides), kept for clarity


def _choose_block_rows(rows: int, lane: int, dtype, vmem_budget_bytes: int) -> int:
    """Pick block_rows so each pipelined buffer uses ~budget/4 bytes."""
    itemsize = jnp.dtype(dtype).itemsize
    sub = _sublane_multiple(dtype)
    bytes_per_row = lane * itemsize

    # 4 pipelined buffers: input + output, each double-buffered.
    per_buffer = max(sub * bytes_per_row, vmem_budget_bytes // 4)
    block_rows = max(sub, (per_buffer // bytes_per_row) // sub * sub)

    # Keep >= _MIN_GRID_STEPS grid steps when there is enough data, so the
    # "parallel" axis can be sharded across v7x's two TensorCores.
    if rows > block_rows and rows > _MIN_GRID_STEPS * sub:
        cap = max(sub, _round_up(pl.cdiv(rows, _MIN_GRID_STEPS), sub))
        block_rows = min(block_rows, cap)

    if block_rows >= rows:
        # Single full-extent block (always a legal block shape).
        block_rows = rows
    return block_rows


def _relu_pallas_2d(x2d: jax.Array, block_rows: int, *, alias_input: bool) -> jax.Array:
    """ReLU over a (rows, lane) array; lane % 128 == 0.

    rows need NOT be a multiple of block_rows: Pallas masks the partial last
    row-block (no extra HBM traffic).
    """
    rows, lane = x2d.shape
    grid = (pl.cdiv(rows, block_rows),)
    total = rows * lane
    itemsize = jnp.dtype(x2d.dtype).itemsize

    extra = {}
    if alias_input:
        # Only alias when the input is a fresh staging buffer (padded copy);
        # aliasing a view of the caller's un-donated img would force XLA to
        # insert a defensive full copy.
        extra["input_output_aliases"] = {0: 0}

    return pl.pallas_call(
        _relu_kernel,
        out_shape=jax.ShapeDtypeStruct((rows, lane), x2d.dtype),
        grid_spec=pltpu.PrefetchScalarGridSpec(
            num_scalar_prefetch=0,
            grid=grid,
            in_specs=[pl.BlockSpec((block_rows, lane), lambda i: (i, 0))],
            out_specs=pl.BlockSpec((block_rows, lane), lambda i: (i, 0)),
        ),
        compiler_params=pltpu.CompilerParams(
            # Row axis is embarrassingly parallel -> lets v7x shard grid steps
            # across its 2 TensorCores (no-op on v5e/v6e).
            dimension_semantics=("parallel",),
            # Pipelined footprint is <= 24 MiB; 48 MiB ceiling is safe on
            # v5e/v6e (128 MiB physical) and v7x (64 MiB physical per TC).
            vmem_limit_bytes=_VMEM_LIMIT_BYTES,
        ),
        cost_estimate=pl.CostEstimate(
            flops=total,
            transcendentals=0,
            bytes_accessed=2 * total * itemsize,
        ),
        **extra,
    )(x2d)


def cond_relu(inputs, *, vmem_budget_bytes: int = _VMEM_BUDGET_BYTES):
    """Pallas equivalent of CondReLU.forward.

    inputs: tuple (img, label); img is NCHW (any shape works — it is flattened).
    Returns (relu(img), label).
    """
    img, label = inputs
    orig_shape = img.shape
    total = img.size

    if total == 0:
        return (img, label)

    lane, needs_pad = _pick_lane(total)
    padded_total = _round_up(total, lane) if needs_pad else total
    rows = padded_total // lane
    block_rows = _choose_block_rows(rows, lane, img.dtype, vmem_budget_bytes)

    flat = img.reshape(-1)
    if needs_pad:
        # Only when total % 128 != 0 (at most 127 extra elements).
        flat = jnp.pad(flat, (0, padded_total - total))
    x2d = flat.reshape(rows, lane)

    out2d = _relu_pallas_2d(x2d, block_rows, alias_input=needs_pad)
    if needs_pad:
        out = out2d.reshape(-1)[:total].reshape(orig_shape)
    else:
        out = out2d.reshape(orig_shape)

    # label is passed through unchanged (identity; no kernel needed).
    return (out, label)


if __name__ == "__main__":
    key = jax.random.PRNGKey(0)
    k_img, k_lab, k_img2 = jax.random.split(key, 3)

    # Small shapes consistent with the module: img NCHW, label = class ids.
    img = jax.random.normal(k_img, (2, 4, 16, 16), dtype=jnp.float32)
    label = jax.random.randint(k_lab, (2,), 0, 10, dtype=jnp.int32)

    # Reference computed up-front (img itself is never donated/mutated).
    ref = jnp.maximum(img, 0.0)

    out_img, out_label = cond_relu((img, label))
    jax.block_until_ready(out_img)
    jax.block_until_ready(out_label)

    assert out_img.shape == img.shape and out_img.dtype == img.dtype
    assert jnp.allclose(out_img, ref), "ReLU mismatch"
    assert jnp.array_equal(out_label, label), "label passthrough mismatch"

    # Also exercise the ragged path (total not a multiple of 128 -> pad+alias).
    img2 = jax.random.normal(k_img2, (2, 3, 7, 5), dtype=jnp.float32)
    ref2 = jnp.maximum(img2, 0.0)
    out_img2, out_label2 = cond_relu((img2, label))
    jax.block_until_ready(out_img2)
    assert out_img2.shape == img2.shape
    assert jnp.allclose(out_img2, ref2), "ReLU mismatch (ragged path)"
    assert jnp.array_equal(out_label2, label), "label passthrough mismatch (ragged)"

    print("KERNEL_OK")
</pallas_src>

<mosaic_0001>
module attributes {stable_mosaic.version = 11 : i64} {
  func.func @_relu_kernel(%arg0: i32, %arg1: memref<1x2048xf32, #tpu.memory_space<vmem>>, %arg2: memref<1x2048xf32, #tpu.memory_space<vmem>>) attributes {dimension_semantics = [#tpu.dimension_semantics<parallel>], iteration_bounds = array<i64: 1>, scalar_prefetch = 0 : i64, scratch_operands = 0 : i64, tpu.core_type = #tpu.core_type<tc>, window_params = [{transform_indices = @transform_0, window_bounds = array<i64: 1, 2048>}, {transform_indices = @transform_1, window_bounds = array<i64: 1, 2048>}]} {
    %c0 = arith.constant 0 : index
    %c0_0 = arith.constant 0 : index
    %0 = vector.load %arg1[%c0, %c0_0] : memref<1x2048xf32, #tpu.memory_space<vmem>>, vector<1x2048xf32>
    %cst = arith.constant 0.000000e+00 : f32
    %1 = vector.broadcast %cst : f32 to vector<1x2048xf32>
    %2 = arith.maximumf %0, %1 : vector<1x2048xf32>
    %c0_1 = arith.constant 0 : index
    %c0_2 = arith.constant 0 : index
    %3 = vector.load %arg2[%c0_1, %c0_2] : memref<1x2048xf32, #tpu.memory_space<vmem>>, vector<1x2048xf32>
    tpu.vector_store %arg2[%c0_1, %c0_2], %2 {strides = array<i32>} : memref<1x2048xf32, #tpu.memory_space<vmem>>, vector<1x2048xf32>,
    return
  }
  func.func @transform_0(%arg0: i32) -> (i32, i32) {
    %c0_i32 = arith.constant 0 : i32
    %c0_i32_0 = arith.constant 0 : i32
    return %arg0, %c0_i32 : i32, i32
  }
  func.func @transform_1(%arg0: i32) -> (i32, i32) {
    %c0_i32 = arith.constant 0 : i32
    %c0_i32_0 = arith.constant 0 : i32
    return %arg0, %c0_i32 : i32, i32
  }
}

</mosaic_0001>

<bundles_post_ra>
// kernel: tpu_custom_call.1
= control target key start
LH: loop header
LB: loop body
LE: loop exit
PB: predicated region body
PF: predicated region fallthrough
CT: control target
= control target key end

     0   :  { %6 = vsyncpa [#allocation3], 0  ;;  %s128_s0 = inlined_call_operand.hbm [shape: f32[1,2048], index: 0, kind: input, shape index: {}]   ;;  %s129_s1 = inlined_call_operand.hbm [shape: f32[1,2048], index: 1, kind: output, shape index: {}]  }
   0x1   :  { %7 = vsyncpa [#allocation4], 0  ;;  %s92_s6 = smov [#allocation2]   ;;  %s44_s10 = scalar_lea.hbm %s128_s0, 256 }
   0x2   :  { %s14_s7 = sshll.u32 %s92_s6, 4  ;;  %p45_p0 = scmp.ne.s32.totalorder %s128_s0, %s44_s10  ;;  %s15_s7 = int_to_ptr.vmem [resolvable:$true] %s14_s7 }
   0x3   :  { %p48_p1 = scmp.lt.u32.totalorder %s44_s10, %s128_s0 }
   0x5   :  { %p50_p2 = pnand %p48_p1, %p45_p0 }
   0x7   :  { %53 = shalt.err (!%p50_p2)
}
   0x8   :  { %s54_s15 = scalar_lea.vmem %s15_s7, 256  ;;  %p59_p4 = scmp.lt.s32.totalorder %s15_s7, %s15_s7 }
   0x9   :  { %p55_p3 = scmp.ne.s32.totalorder %s15_s7, %s54_s15  ;;  %p60_p5 = scmp.lt.s32.totalorder %s54_s15, %s54_s15 }
   0xb   :  { %p61_p6 = por %p60_p5, %p59_p4 }
   0xd   :  { %p62_p7 = pnand %p61_p6, %p55_p3 }
   0xf   :  { %65 = shalt.err (!%p62_p7)
}
  0x10   :  { %17 = dma.hbm_to_vmem [thread:$0]  %s128_s0, 256, %s15_s7, [#allocation3]  }
  0x11   :  { %88 = dma.done.wait [#allocation3], 256  }
  0x12   :  { %89 = vsyncadd [#allocation3], 4294967040  ;;  %s93_s18 = smov [#allocation5]   ;;  %v21_v0 = vld [vmem:[#allocation2] sm:$0xff]  ;;  %v22_v1 = vld [vmem:[#allocation2 + $0x8] sm:$0xff] }
  0x13   :  { %s33_s19 = sshll.u32 %s93_s18, 4  ;;  %v23_v2 = vmax.f32 %v21_v0, 0.0  ;;  %v24_v3 = vmax.f32 %v22_v1, 0.0  ;;  %s34_s19 = int_to_ptr.vmem [resolvable:$true] %s33_s19 }
  0x14   :  { %s66_s20 = scalar_lea.vmem %s34_s19, 256  ;;  %p71_p9 = scmp.lt.s32.totalorder %s34_s19, %s34_s19 }
  0x15   :  { %25 = vst [vmem:[#allocation5] sm:$0xff] %v23_v2  ;;  %26 = vst [vmem:[#allocation5 + $0x8] sm:$0xff] %v24_v3  ;;  %p67_p8 = scmp.ne.s32.totalorder %s34_s19, %s66_s20  ;;  %p72_p10 = scmp.lt.s32.totalorder %s66_s20, %s66_s20 }
  0x17   :  { %p73_p11 = por %p72_p10, %p71_p9 }
  0x19   :  { %p74_p12 = pnand %p73_p11, %p67_p8 }
  0x1b   :  { %77 = shalt.err (!%p74_p12)
}
  0x1c   :  { %s78_s22 = scalar_lea.hbm %s129_s1, 256 }
  0x1d   :  { %p79_p13 = scmp.ne.s32.totalorder %s129_s1, %s78_s22  ;;  %p82_p0 = scmp.lt.u32.totalorder %s78_s22, %s129_s1 }
  0x1f   :  { %p84_p1 = pnand %p82_p0, %p79_p13 }
  0x21   :  { %87 = shalt.err (!%p84_p1)
}
  0x22   :  { %36 = dma.vmem_to_hbm [thread:$0]  %s34_s19, 256, %s129_s1, [#allocation4]  }
  0x23   :  { %90 = dma.done.wait [#allocation4], 256  }
  0x24   :  { %91 = vsyncadd [#allocation4], 4294967040 }
  0x25   :  { %40 = vsyncpa [#allocation3], 1 }
  0x26   :  { %41 = vsyncpa [#allocation4], 1 }

</bundles_post_ra>
